<compile_context>
chip_gen: v5e
topology: v5e:2x2
jax: 0.10.0
libtpu: 0.0.40
codegen_flags: <defaults>
</compile_context>

<pallas_src>
import functools

import jax
import jax.numpy as jnp
from jax.experimental import pallas as pl
from jax.experimental.pallas import tpu as pltpu

CHANNELS = 128
RATIO = 16
HIDDEN = CHANNELS // RATIO  # 8


def _round_up(x, m):
    return ((x + m - 1) // m) * m


def _vmem_capacity_bytes():
    """Physical VMEM per TensorCore; conservative (v7x-sized) fallback."""
    try:
        info = pltpu.get_tpu_info()
        cap = getattr(info, "vmem_capacity_bytes", None)
        if cap:
            return int(cap)
    except Exception:
        pass
    return 64 * 1024 * 1024  # v7x-safe default


def channel_attention_kernel(x_ref, w1_ref, b1_ref, w2_ref, b2_ref, o_ref,
                             *, num_groups):
    # x_ref / o_ref: (TB, G*128); weights are tiny resident blocks.

    # Group mean over the G aligned 128-lane slices (accumulate in f32).
    acc = x_ref[:, 0:CHANNELS].astype(jnp.float32)
    for g in range(1, num_groups):
        acc = acc + x_ref[:, g * CHANNELS:(g + 1) * CHANNELS].astype(jnp.float32)
    gap = acc * jnp.float32(1.0 / num_groups)                 # (TB, 128)

    # fc: Linear(128 -> 8) + ReLU
    h = jnp.dot(gap, w1_ref[...], preferred_element_type=jnp.float32) + b1_ref[...]
    h = jnp.maximum(h, 0.0)                                   # (TB, 8)

    # fc: Linear(8 -> 128) + Sigmoid
    logits = jnp.dot(h, w2_ref[...], preferred_element_type=jnp.float32) + b2_ref[...]
    weights = jax.nn.sigmoid(logits)                          # (TB, 128) f32

    # Broadcast-multiply each 128-lane group slice; lane-dense stores.
    # (Weights cast to the input dtype first -- matches the PyTorch module,
    #  marginally lower precision than multiplying in f32 for bf16 inputs.)
    w_x = weights.astype(x_ref.dtype)
    for g in range(num_groups):
        sl = slice(g * CHANNELS, (g + 1) * CHANNELS)
        o_ref[:, sl] = (x_ref[:, sl] * w_x).astype(o_ref.dtype)


def channel_attention(x, w1, b1, w2, b2, num_groups, *,
                      target_tile_bytes=8 * 1024 * 1024):
    """x: [B, G*128] -> [B, G*128]"""
    B, W = x.shape
    assert W == num_groups * CHANNELS, "expected x of shape [B, num_groups*128]"

    itemsize = jnp.dtype(x.dtype).itemsize
    row_bytes = W * itemsize
    weight_bytes = 4 * (CHANNELS * HIDDEN + HIDDEN + HIDDEN * CHANNELS + CHANNELS)

    # ---- VMEM budgeting (per-generation, derived from physical VMEM) ----
    vmem_capacity = _vmem_capacity_bytes()
    # ~96 MiB on 128 MiB chips (v5e/v6e), ~48 MiB on v7x's 64 MiB.
    vmem_limit = int(vmem_capacity) * 3 // 4
    # 4 pipelined x/o buffers (input + output, each double-buffered) + resident
    # weight blocks (double-buffered) + headroom for compiler scratch.
    per_buffer_budget = (vmem_limit - 4 * weight_bytes - (2 << 20)) // 4
    tile_bytes = min(target_tile_bytes, per_buffer_budget)

    if row_bytes > per_buffer_budget:
        # TODO(synk): two-pass width split (second grid axis over G, group-sum
        # accumulated into a (TB,128) scratch across an 'arbitrary' width axis)
        # for extreme num_groups where a single row no longer fits VMEM.
        raise ValueError(
            f"num_groups={num_groups} too large for single-axis tiling: one row "
            f"is {row_bytes} bytes but the per-buffer VMEM budget is "
            f"{per_buffer_budget} bytes.")

    # Rows per grid step: sized purely by bytes (no arbitrary row cap),
    # sublane-aligned (multiple of 8) whenever possible.
    tb = max(1, tile_bytes // row_bytes)
    if tb >= 8:
        tb = (tb // 8) * 8
    # Guarantee >= 2 grid steps for larger batches so the 'parallel' axis can
    # shard across v7x's two TensorCores.
    if B > 8:
        tb = min(tb, max(8, _round_up(pl.cdiv(B, 2), 8)))
    tb = min(tb, B)

    grid = (pl.cdiv(B, tb),)

    # Advisory cost estimate: this op is HBM-bandwidth bound.
    cost = pl.CostEstimate(
        flops=B * (2 * CHANNELS * HIDDEN * 2 + (num_groups + 1) * CHANNELS),
        transcendentals=B * CHANNELS,                      # sigmoid
        bytes_accessed=2 * B * W * itemsize + weight_bytes,
    )

    kernel = functools.partial(channel_attention_kernel, num_groups=num_groups)

    out = pl.pallas_call(
        kernel,
        out_shape=jax.ShapeDtypeStruct((B, W), x.dtype),
        grid_spec=pltpu.PrefetchScalarGridSpec(
            num_scalar_prefetch=0,
            grid=grid,
            in_specs=[
                pl.BlockSpec((tb, W), lambda i: (i, 0)),             # x tile
                pl.BlockSpec((CHANNELS, HIDDEN), lambda i: (0, 0)),  # w1 (resident)
                pl.BlockSpec((1, HIDDEN), lambda i: (0, 0)),         # b1
                pl.BlockSpec((HIDDEN, CHANNELS), lambda i: (0, 0)),  # w2
                pl.BlockSpec((1, CHANNELS), lambda i: (0, 0)),       # b2
            ],
            out_specs=pl.BlockSpec((tb, W), lambda i: (i, 0)),
        ),
        compiler_params=pltpu.CompilerParams(
            dimension_semantics=("parallel",),
            vmem_limit_bytes=int(vmem_limit),
        ),
        cost_estimate=cost,
    )(x, w1, b1, w2, b2)

    return out


def reference(x, w1, b1, w2, b2, num_groups):
    """Pure-JAX reference matching the PyTorch forward."""
    B = x.shape[0]
    xg = x.reshape(B, num_groups, CHANNELS)
    gap = jnp.mean(xg, axis=1)
    h = jnp.maximum(gap @ w1 + b1, 0.0)
    w = jax.nn.sigmoid(h @ w2 + b2)
    return (xg * w[:, None, :]).reshape(B, -1)


if __name__ == "__main__":
    G = 4  # num_groups

    key = jax.random.PRNGKey(0)
    kx, k1, k2, k3, k4, kx2 = jax.random.split(key, 6)

    # Deterministic parameter init (Linear weights stored as (in, out)).
    bound1 = 1.0 / jnp.sqrt(CHANNELS)
    bound2 = 1.0 / jnp.sqrt(HIDDEN)
    w1 = jax.random.uniform(k1, (CHANNELS, HIDDEN), jnp.float32, -bound1, bound1)
    b1 = jax.random.uniform(k2, (1, HIDDEN), jnp.float32, -bound1, bound1)
    w2 = jax.random.uniform(k3, (HIDDEN, CHANNELS), jnp.float32, -bound2, bound2)
    b2 = jax.random.uniform(k4, (1, CHANNELS), jnp.float32, -bound2, bound2)

    # --- Test 1: small batch (single full-batch block, grid=(1,)) ---
    B = 2
    x = jax.random.normal(kx, (B, G * CHANNELS), jnp.float32)
    out = channel_attention(x, w1, b1, w2, b2, num_groups=G)
    out = jax.block_until_ready(out)
    ref = reference(x, w1, b1.reshape(-1), w2, b2.reshape(-1), G)
    assert out.shape == (B, G * CHANNELS)
    assert jnp.allclose(out, ref, atol=1e-5, rtol=1e-5), "mismatch vs reference (B=2)"

    # --- Test 2: multi-step grid with a partial last tile (B=20 -> tb=16, grid=2) ---
    B2 = 20
    x2 = jax.random.normal(kx2, (B2, G * CHANNELS), jnp.float32)
    out2 = channel_attention(x2, w1, b1, w2, b2, num_groups=G)
    out2 = jax.block_until_ready(out2)
    ref2 = reference(x2, w1, b1.reshape(-1), w2, b2.reshape(-1), G)
    assert out2.shape == (B2, G * CHANNELS)
    assert jnp.allclose(out2, ref2, atol=1e-5, rtol=1e-5), "mismatch vs reference (B=20)"

    print("KERNEL_OK")
</pallas_src>

<mosaic_0001>
module attributes {stable_mosaic.version = 11 : i64} {
  func.func @channel_attention_kernel(%arg0: i32, %arg1: memref<2x512xf32, #tpu.memory_space<vmem>>, %arg2: memref<128x8xf32, #tpu.memory_space<vmem>>, %arg3: memref<1x8xf32, #tpu.memory_space<vmem>>, %arg4: memref<8x128xf32, #tpu.memory_space<vmem>>, %arg5: memref<1x128xf32, #tpu.memory_space<vmem>>, %arg6: memref<2x512xf32, #tpu.memory_space<vmem>>) attributes {dimension_semantics = [#tpu.dimension_semantics<parallel>], iteration_bounds = array<i64: 1>, scalar_prefetch = 0 : i64, scratch_operands = 0 : i64, tpu.core_type = #tpu.core_type<tc>, window_params = [{transform_indices = @transform_0, window_bounds = array<i64: 2, 512>}, {pipeline_mode = #tpu.pipeline_mode<synchronous>, transform_indices = @transform_1, window_bounds = array<i64: 128, 8>}, {pipeline_mode = #tpu.pipeline_mode<synchronous>, transform_indices = @transform_2, window_bounds = array<i64: 1, 8>}, {pipeline_mode = #tpu.pipeline_mode<synchronous>, transform_indices = @transform_3, window_bounds = array<i64: 8, 128>}, {pipeline_mode = #tpu.pipeline_mode<synchronous>, transform_indices = @transform_4, window_bounds = array<i64: 1, 128>}, {transform_indices = @transform_5, window_bounds = array<i64: 2, 512>}]} {
    %c0 = arith.constant 0 : index
    %c0_0 = arith.constant 0 : index
    %0 = vector.load %arg1[%c0, %c0_0] : memref<2x512xf32, #tpu.memory_space<vmem>>, vector<2x128xf32>
    %c0_1 = arith.constant 0 : index
    %c128 = arith.constant 128 : index
    %1 = vector.load %arg1[%c0_1, %c128] : memref<2x512xf32, #tpu.memory_space<vmem>>, vector<2x128xf32>
    %2 = arith.addf %0, %1 : vector<2x128xf32>
    %c0_2 = arith.constant 0 : index
    %c256 = arith.constant 256 : index
    %3 = vector.load %arg1[%c0_2, %c256] : memref<2x512xf32, #tpu.memory_space<vmem>>, vector<2x128xf32>
    %4 = arith.addf %2, %3 : vector<2x128xf32>
    %c0_3 = arith.constant 0 : index
    %c384 = arith.constant 384 : index
    %5 = vector.load %arg1[%c0_3, %c384] : memref<2x512xf32, #tpu.memory_space<vmem>>, vector<2x128xf32>
    %6 = arith.addf %4, %5 : vector<2x128xf32>
    %cst = arith.constant 2.500000e-01 : f32
    %7 = vector.broadcast %cst : f32 to vector<2x128xf32>
    %8 = arith.mulf %6, %7 : vector<2x128xf32>
    %c0_4 = arith.constant 0 : index
    %c0_5 = arith.constant 0 : index
    %9 = vector.load %arg2[%c0_4, %c0_5] : memref<128x8xf32, #tpu.memory_space<vmem>>, vector<128x8xf32>
    %cst_6 = arith.constant dense<0.000000e+00> : vector<2x8xf32>
    %10 = tpu.matmul %8, %9, %cst_6 {dimension_numbers = #tpu.dot_dimension_numbers<[1], [0], [0], [1], [0, 0, 1, 1], [], []>} : vector<2x128xf32>, vector<128x8xf32>, vector<2x8xf32> -> vector<2x8xf32>
    %c0_7 = arith.constant 0 : index
    %c0_8 = arith.constant 0 : index
    %11 = vector.load %arg3[%c0_7, %c0_8] : memref<1x8xf32, #tpu.memory_space<vmem>>, vector<1x8xf32>
    %12 = vector.broadcast %11 : vector<1x8xf32> to vector<2x8xf32>
    %13 = arith.addf %10, %12 : vector<2x8xf32>
    %cst_9 = arith.constant 0.000000e+00 : f32
    %14 = vector.broadcast %cst_9 : f32 to vector<2x8xf32>
    %15 = arith.maximumf %13, %14 : vector<2x8xf32>
    %c0_10 = arith.constant 0 : index
    %c0_11 = arith.constant 0 : index
    %16 = vector.load %arg4[%c0_10, %c0_11] : memref<8x128xf32, #tpu.memory_space<vmem>>, vector<8x128xf32>
    %cst_12 = arith.constant dense<0.000000e+00> : vector<2x128xf32>
    %17 = tpu.matmul %15, %16, %cst_12 {dimension_numbers = #tpu.dot_dimension_numbers<[1], [0], [0], [1], [0, 0, 1, 1], [], []>} : vector<2x8xf32>, vector<8x128xf32>, vector<2x128xf32> -> vector<2x128xf32>
    %c0_13 = arith.constant 0 : index
    %c0_14 = arith.constant 0 : index
    %18 = vector.load %arg5[%c0_13, %c0_14] : memref<1x128xf32, #tpu.memory_space<vmem>>, vector<1x128xf32>
    %19 = vector.broadcast %18 : vector<1x128xf32> to vector<2x128xf32>
    %20 = arith.addf %17, %19 : vector<2x128xf32>
    %21 = arith.negf %20 : vector<2x128xf32>
    %22 = math.exp %21 : vector<2x128xf32>
    %cst_15 = arith.constant 1.000000e+00 : f32
    %23 = vector.broadcast %cst_15 : f32 to vector<2x128xf32>
    %24 = arith.addf %23, %22 : vector<2x128xf32>
    %25 = arith.divf %23, %24 : vector<2x128xf32>
    %c0_16 = arith.constant 0 : index
    %c0_17 = arith.constant 0 : index
    %26 = vector.load %arg1[%c0_16, %c0_17] : memref<2x512xf32, #tpu.memory_space<vmem>>, vector<2x128xf32>
    %27 = arith.mulf %26, %25 : vector<2x128xf32>
    %c0_18 = arith.constant 0 : index
    %c0_19 = arith.constant 0 : index
    %28 = vector.load %arg6[%c0_18, %c0_19] : memref<2x512xf32, #tpu.memory_space<vmem>>, vector<2x128xf32>
    tpu.vector_store %arg6[%c0_18, %c0_19], %27 {strides = array<i32>} : memref<2x512xf32, #tpu.memory_space<vmem>>, vector<2x128xf32>,
    %c0_20 = arith.constant 0 : index
    %c128_21 = arith.constant 128 : index
    %29 = vector.load %arg1[%c0_20, %c128_21] : memref<2x512xf32, #tpu.memory_space<vmem>>, vector<2x128xf32>
    %30 = arith.mulf %29, %25 : vector<2x128xf32>
    %c0_22 = arith.constant 0 : index
    %c128_23 = arith.constant 128 : index
    %31 = vector.load %arg6[%c0_22, %c128_23] : memref<2x512xf32, #tpu.memory_space<vmem>>, vector<2x128xf32>
    tpu.vector_store %arg6[%c0_22, %c128_23], %30 {strides = array<i32>} : memref<2x512xf32, #tpu.memory_space<vmem>>, vector<2x128xf32>,
    %c0_24 = arith.constant 0 : index
    %c256_25 = arith.constant 256 : index
    %32 = vector.load %arg1[%c0_24, %c256_25] : memref<2x512xf32, #tpu.memory_space<vmem>>, vector<2x128xf32>
    %33 = arith.mulf %32, %25 : vector<2x128xf32>
    %c0_26 = arith.constant 0 : index
    %c256_27 = arith.constant 256 : index
    %34 = vector.load %arg6[%c0_26, %c256_27] : memref<2x512xf32, #tpu.memory_space<vmem>>, vector<2x128xf32>
    tpu.vector_store %arg6[%c0_26, %c256_27], %33 {strides = array<i32>} : memref<2x512xf32, #tpu.memory_space<vmem>>, vector<2x128xf32>,
    %c0_28 = arith.constant 0 : index
    %c384_29 = arith.constant 384 : index
    %35 = vector.load %arg1[%c0_28, %c384_29] : memref<2x512xf32, #tpu.memory_space<vmem>>, vector<2x128xf32>
    %36 = arith.mulf %35, %25 : vector<2x128xf32>
    %c0_30 = arith.constant 0 : index
    %c384_31 = arith.constant 384 : index
    %37 = vector.load %arg6[%c0_30, %c384_31] : memref<2x512xf32, #tpu.memory_space<vmem>>, vector<2x128xf32>
    tpu.vector_store %arg6[%c0_30, %c384_31], %36 {strides = array<i32>} : memref<2x512xf32, #tpu.memory_space<vmem>>, vector<2x128xf32>,
    return
  }
  func.func @transform_0(%arg0: i32) -> (i32, i32) {
    %c0_i32 = arith.constant 0 : i32
    %c0_i32_0 = arith.constant 0 : i32
    return %arg0, %c0_i32 : i32, i32
  }
  func.func @transform_1(%arg0: i32) -> (i32, i32) {
    %c0_i32 = arith.constant 0 : i32
    %c0_i32_0 = arith.constant 0 : i32
    %c0_i32_1 = arith.constant 0 : i32
    return %c0_i32, %c0_i32_0 : i32, i32
  }
  func.func @transform_2(%arg0: i32) -> (i32, i32) {
    %c0_i32 = arith.constant 0 : i32
    %c0_i32_0 = arith.constant 0 : i32
    %c0_i32_1 = arith.constant 0 : i32
    return %c0_i32, %c0_i32_0 : i32, i32
  }
  func.func @transform_3(%arg0: i32) -> (i32, i32) {
    %c0_i32 = arith.constant 0 : i32
    %c0_i32_0 = arith.constant 0 : i32
    %c0_i32_1 = arith.constant 0 : i32
    return %c0_i32, %c0_i32_0 : i32, i32
  }
  func.func @transform_4(%arg0: i32) -> (i32, i32) {
    %c0_i32 = arith.constant 0 : i32
    %c0_i32_0 = arith.constant 0 : i32
    %c0_i32_1 = arith.constant 0 : i32
    return %c0_i32, %c0_i32_0 : i32, i32
  }
  func.func @transform_5(%arg0: i32) -> (i32, i32) {
    %c0_i32 = arith.constant 0 : i32
    %c0_i32_0 = arith.constant 0 : i32
    return %arg0, %c0_i32 : i32, i32
  }
}

</mosaic_0001>

<bundles_post_ra>
// kernel: tpu_custom_call.1
= control target key start
LH: loop header
LB: loop body
LE: loop exit
PB: predicated region body
PF: predicated region fallthrough
CT: control target
= control target key end

     0   :  { %s292_s0 = inlined_call_operand.vmem [shape: f32[2,512], index: 0, kind: input, shape index: {}]   ;;  %s293_s1 = inlined_call_operand.vmem [shape: f32[128,8], index: 1, kind: input, shape index: {}]   ;;  %s294_s2 = inlined_call_operand.vmem [shape: f32[1,8], index: 2, kind: input, shape index: {}]   ;;  %s295_s3 = inlined_call_operand.vmem [shape: f32[8,128], index: 3, kind: input, shape index: {}]   ;;  %s296_s4 = inlined_call_operand.vmem [shape: f32[1,128], index: 4, kind: input, shape index: {}]   ;;  %s297_s5 = inlined_call_operand.hbm [shape: f32[2,512], index: 5, kind: output, shape index: {}]  }
   0x1   :  { %v44_v0 = vld [vmem:[%s293_s1 + $0x78] sm:$0xff]  ;;  %v43_v1 = vld [vmem:[%s293_s1 + $0x70] sm:$0xff]  ;;  %v42_v2 = vld [vmem:[%s293_s1 + $0x68] sm:$0xff] }
   0x2   :  { %49 = vmatpush.msra.mxu0 %v44_v0  ;;  %v41_v3 = vld [vmem:[%s293_s1 + $0x60] sm:$0xff]  ;;  %v40_v4 = vld [vmem:[%s293_s1 + $0x58] sm:$0xff] }
   0x4   :  { %50 = vmatpush.msra.mxu0 %v43_v1 }
   0x6   :  { %51 = vmatpush.msra.mxu0 %v42_v2 }
   0x8   :  { %52 = vmatpush.msra.mxu0 %v41_v3 }
   0x9   :  { %10 = vsyncpa [#allocation3], 0  ;;  %v39_v5 = vld [vmem:[%s293_s1 + $0x50] sm:$0xff]  ;;  %v38_v6 = vld [vmem:[%s293_s1 + $0x48] sm:$0xff]  ;;  %vm75_vm0 = vcmask 64512   ;;  %s180_s16 = smov [#allocation2]  }
   0xa   :  { %53 = vmatpush.msra.mxu0 %v40_v4  ;;  %v37_v7 = vld [vmem:[%s293_s1 + $0x40] sm:$0xff]  ;;  %v36_v10 = vld [vmem:[%s293_s1 + $0x38] sm:$0xff]  ;;  %v35_v11 = vld [vmem:[%s293_s1 + $0x30] sm:$0xff]  ;;  %s134_s17 = sshll.u32 %s180_s16, 4  ;;  %s136_s20 = sshll.u32 %s297_s5, 4  ;;  %s135_s17 = int_to_ptr.vmem [resolvable:$true] %s134_s17  ;;  %s137_s20 = int_to_ptr.hbm [resolvable:$true] %s136_s20 }
   0xb   :  { %v21_v8 = vld [vmem:[%s292_s0] sm:$0x3]  ;;  %v22_v9 = vld [vmem:[%s292_s0 + $0x2] sm:$0x3]  ;;  %v24_v13 = vld [vmem:[%s292_s0 + $0x4] sm:$0x3] }
   0xc   :  { %54 = vmatpush.msra.mxu0 %v39_v5  ;;  %v23_v12 = vadd.f32 %v22_v9, %v21_v8  ;;  %v34_v14 = vld [vmem:[%s293_s1 + $0x28] sm:$0xff]  ;;  %v33_v15 = vld [vmem:[%s293_s1 + $0x20] sm:$0xff]  ;;  %v32_v18 = vld [vmem:[%s293_s1 + $0x18] sm:$0xff] }
   0xd   :  { %v26_v17 = vld [vmem:[%s292_s0 + $0x6] sm:$0x3]  ;;  %v31_v19 = vld [vmem:[%s293_s1 + $0x10] sm:$0xff]  ;;  %v30_v21 = vld [vmem:[%s293_s1 + $0x8] sm:$0xff] }
   0xe   :  { %55 = vmatpush.msra.mxu0 %v38_v6  ;;  %v25_v16 = vadd.f32 %v24_v13, %v23_v12  ;;  %v29_v22 = vld [vmem:[%s293_s1] sm:$0xff] }
   0xf   :  { %v70_v24 = vld [vmem:[%s295_s3] sm:$0xff] }
  0x10   :  { %56 = vmatpush.msra.mxu0 %v37_v7  ;;  %v27_v20 = vadd.f32 %v26_v17, %v25_v16  ;;  %94 = vmatpush.msra.mxu1 %v70_v24  ;;  %v148_v25 = vld [vmem:[%s294_s2] ss:$0 sm:$0xff]  ;;  %v120_v43 = vld [vmem:[%s292_s0 + $0x2] sm:$0x3]  ;;  %v123_v44 = vld [vmem:[%s292_s0 + $0x4] sm:$0x3] }
  0x11   :  { %v149_v29 = vld [vmem:[%s296_s4] ss:$0 sm:$0xff]  ;;  %v126_v46 = vld [vmem:[%s292_s0 + $0x6] sm:$0x3] }
  0x12   :  { %57 = vmatpush.msra.mxu0 %v36_v10  ;;  %v28_v23 = vmul.f32 0.25, %v27_v20 }
  0x14   :  { %58 = vmatpush.msra.mxu0 %v35_v11 }
  0x16   :  { %59 = vmatpush.msra.mxu0 %v34_v14 }
  0x18   :  { %60 = vmatpush.msra.mxu0 %v33_v15 }
  0x1a   :  { %61 = vmatpush.msra.mxu0 %v32_v18 }
  0x1c   :  { %62 = vmatpush.msra.mxu0 %v31_v19 }
  0x1e   :  { %63 = vmatpush.msra.mxu0 %v30_v21 }
  0x20   :  { %64 = vmatpush.msra.mxu0 %v29_v22 }
  0x21   :  { %65 = vmatmul.f32.vlgmr.msra.gmra.mxu0 %v28_v23 }
  0x9e   :  { %v66_v26 = vpop.f32.mrf.mxu0 }
  0x9f   :  { %v67_v27 = vadd.f32 %v148_v25, %v66_v26 }
  0xa1   :  { %v69_v28 = vmax.f32 %v67_v27, 0.0 }
  0xa3   :  { %145 = vmatmul.msk.f32.vlgmr.msra.gmra.mxu1 %vm75_vm0, %v69_v28 }
 0x120   :  { %v96_v30 = vpop.f32.mrf.mxu1 }
 0x121   :  { %v97_v31 = vadd.f32 %v149_v29, %v96_v30 }
 0x123   :  { %v146_v32 = vmul.f32 -1.442695, %v97_v31 }
 0x125   :  { %150 = vpow2.f32 %v146_v32 }
 0x12b   :  { %v151_v33 = vpop.eup %150 }
 0x12c   :  { %v102_v34 = vadd.f32 1.0, %v151_v33 }
 0x12e   :  { %152 = vrcp.f32 %v102_v34  ;;  %v114_v38 = vand.u32 2147483648, %v102_v34  ;;  %v112_v40 = vand.u32 2147483647, %v102_v34  ;;  %vm108_vm2 = vweird.f32 %v102_v34 }
 0x130   :  { %v115_v42 = vor.u32 1.1754944e-38, %v114_v38  ;;  %vm113_vm4 = vcmp.eq.f32.partialorder %v112_v40, 8.507059e+37 }
 0x134   :  { %v153_v35 = vpop.eup %152 }
 0x135   :  { %v104_v36 = vmul.f32 %v153_v35, %v102_v34  ;;  %vm109_vm1 = vweird.f32 %v153_v35 }
 0x136   :  { %vm110_vm3 = vmor %vm108_vm2, %vm109_vm1 }
 0x137   :  { %v105_v37 = vsub.f32 1.0, %v104_v36 }
 0x139   :  { %v106_v39 = vmul.f32 %v153_v35, %v105_v37 }
 0x13b   :  { %v107_v41 = vadd.f32 %v153_v35, %v106_v39 }
 0x13d   :  { %v111_v45 = vsel %vm110_vm3, %v153_v35, %v107_v41 }
 0x13e   :  { %v116_v47 = vsel %vm113_vm4, %v115_v42, %v111_v45 }
 0x13f   :  { %v118_v48 = vmul.f32 %v116_v47, %v21_v8  ;;  %v121_v49 = vmul.f32 %v120_v43, %v116_v47  ;;  %v124_v50 = vmul.f32 %v123_v44, %v116_v47  ;;  %v127_v51 = vmul.f32 %v126_v46, %v116_v47 }
 0x141   :  { %119 = vst [vmem:[#allocation2] sm:$0x3] %v118_v48 }
 0x142   :  { %122 = vst [vmem:[#allocation2 + $0x2] sm:$0x3] %v121_v49 }
 0x143   :  { %125 = vst [vmem:[#allocation2 + $0x4] sm:$0x3] %v124_v50 }
 0x144   :  { %128 = vst [vmem:[#allocation2 + $0x6] sm:$0x3] %v127_v51 }
 0x145   :  { %139 = dma.vmem_to_hbm [thread:$0]  %s135_s17, 128, %s137_s20, [#allocation3]  }
 0x146   :  { %178 = dma.done.wait [#allocation3], 128  }
 0x147   :  { %179 = vsyncadd [#allocation3], 4294967168 }
 0x148   :  { %144 = vsyncpa [#allocation3], 1 }

</bundles_post_ra>
